<compile_context>
chip_gen: v5e
topology: v5e:2x2
jax: 0.10.0
libtpu: 0.0.40
codegen_flags: <defaults>
</compile_context>

<pallas_src>
import jax
import jax.numpy as jnp
from jax.experimental import pallas as pl
from jax.experimental.pallas import tpu as pltpu

EMBEDDING_DIM = 128      # from the module
MAX_SEQ_LENGTH = 512     # from the module
SEQ_LENGTH = 16          # small stand-in for the tokenized sequence length


def posemb_kernel(table_ref, o_ref):
    """Pure tile copy.

    The table BlockSpec's static index_map already selected exactly the rows
    this output needs (positions 0..seq_pad-1), so the 'gather' reduces to a
    single unmasked full-tile vreg copy (one vld/vst pair per vreg).

    table_ref : VMEM (seq_pad, 128) f32  -- first seq_pad table rows
    o_ref     : VMEM (seq_pad, 128) f32  -- output tile
    """
    o_ref[...] = table_ref[...]


def positional_embed(table: jax.Array, seq_length: int) -> jax.Array:
    """table: (MAX_SEQ_LENGTH, EMBEDDING_DIM) f32.

    Position ids are arange(seq_length) by construction (exactly the module's
    forward), so the lookup is statically table[:seq_length]; no ids are
    passed to the kernel.
    """
    max_len, emb = table.shape
    assert seq_length <= max_len
    # Round the block up to a sublane multiple (8); the (8, 128) constraint
    # applies to the BlockSpec, and block 0 is always fully in-bounds because
    # seq_pad <= MAX_SEQ_LENGTH.
    seq_pad = ((seq_length + 7) // 8) * 8

    out = pl.pallas_call(
        posemb_kernel,
        out_shape=jax.ShapeDtypeStruct((seq_pad, emb), table.dtype),
        grid_spec=pl.GridSpec(
            grid=(1,),  # one step: output is a single tile
            in_specs=[
                # Static window: only the first seq_pad rows of the table are
                # DMA'd (8 KiB for seq=16, not the full 256 KiB table).
                pl.BlockSpec((seq_pad, emb), lambda i: (0, 0)),
            ],
            out_specs=pl.BlockSpec((seq_pad, emb), lambda i: (0, 0)),
        ),
    )(table)

    # Drop sublane padding only when it exists (no-op copy avoided otherwise),
    # then unsqueeze(0) -> (1, seq_length, embedding_dim).
    if seq_pad != seq_length:
        out = out[:seq_length]
    return out[None, :, :]


if __name__ == "__main__":
    key = jax.random.PRNGKey(0)
    # nn.Embedding default init: weights ~ Normal(0, 1)
    table = jax.random.normal(
        key, (MAX_SEQ_LENGTH, EMBEDDING_DIM), dtype=jnp.float32)

    out = positional_embed(table, SEQ_LENGTH)
    out = jax.block_until_ready(out)

    # Reference: embedding lookup of arange ids is a leading-row slice.
    ref = table[:SEQ_LENGTH][None, :, :]
    assert out.shape == (1, SEQ_LENGTH, EMBEDDING_DIM), out.shape
    assert jnp.allclose(out, ref), "mismatch vs reference gather"

    print("KERNEL_OK")
</pallas_src>

<mosaic_0001>
module attributes {stable_mosaic.version = 11 : i64} {
  func.func @posemb_kernel(%arg0: i32, %arg1: memref<16x128xf32, #tpu.memory_space<vmem>>, %arg2: memref<16x128xf32, #tpu.memory_space<vmem>>) attributes {dimension_semantics = [#tpu.dimension_semantics<arbitrary>], iteration_bounds = array<i64: 1>, scalar_prefetch = 0 : i64, scratch_operands = 0 : i64, tpu.core_type = #tpu.core_type<tc>, window_params = [{transform_indices = @transform_0, window_bounds = array<i64: 16, 128>}, {pipeline_mode = #tpu.pipeline_mode<synchronous>, transform_indices = @transform_1, window_bounds = array<i64: 16, 128>}]} {
    %c0 = arith.constant 0 : index
    %c0_0 = arith.constant 0 : index
    %0 = vector.load %arg1[%c0, %c0_0] : memref<16x128xf32, #tpu.memory_space<vmem>>, vector<16x128xf32>
    %c0_1 = arith.constant 0 : index
    %c0_2 = arith.constant 0 : index
    %1 = vector.load %arg2[%c0_1, %c0_2] : memref<16x128xf32, #tpu.memory_space<vmem>>, vector<16x128xf32>
    tpu.vector_store %arg2[%c0_1, %c0_2], %0 {strides = array<i32>} : memref<16x128xf32, #tpu.memory_space<vmem>>, vector<16x128xf32>,
    return
  }
  func.func @transform_0(%arg0: i32) -> (i32, i32) {
    %c0_i32 = arith.constant 0 : i32
    %c0_i32_0 = arith.constant 0 : i32
    %c0_i32_1 = arith.constant 0 : i32
    return %c0_i32, %c0_i32_0 : i32, i32
  }
  func.func @transform_1(%arg0: i32) -> (i32, i32) {
    %c0_i32 = arith.constant 0 : i32
    %c0_i32_0 = arith.constant 0 : i32
    %c0_i32_1 = arith.constant 0 : i32
    return %c0_i32, %c0_i32_0 : i32, i32
  }
}

</mosaic_0001>

<bundles_post_ra>
// kernel: tpu_custom_call.1
= control target key start
LH: loop header
LB: loop body
LE: loop exit
PB: predicated region body
PF: predicated region fallthrough
CT: control target
= control target key end

     0   :  { %6 = vsyncpa [#allocation3], 0  ;;  %s124_s0 = inlined_call_operand.hbm [shape: f32[512,128], index: 0, kind: input, shape index: {}]   ;;  %s125_s1 = inlined_call_operand.hbm [shape: f32[16,128], index: 1, kind: output, shape index: {}]  }
   0x1   :  { %7 = vsyncpa [#allocation4], 0  ;;  %s12_s8 = sshll.u32 %s124_s0, 4  ;;  %s104_s9 = smov [#allocation2]   ;;  %s13_s8 = int_to_ptr.hbm [resolvable:$true] %s12_s8 }
   0x2   :  { %s14_s10 = sshll.u32 %s104_s9, 4  ;;  %s105_s11 = smov 128   ;;  %s15_s10 = int_to_ptr.vmem [resolvable:$true] %s14_s10 }
   0x3   :  { %s106_s12 = smov 8  }
   0x4   :  { %20 = dma.hbm_to_vmem [thread:$0]  %s13_s8, 256, %s15_s10, [#allocation3], %s105_s11, %s105_s11, %s106_s12  }
   0x5   :  { %100 = dma.done.wait [#allocation3], 256  }
   0x6   :  { %101 = vsyncadd [#allocation3], 4294967040  ;;  %s107_s13 = smov [#allocation5]   ;;  %s35_s17 = sshll.u32 %s125_s1, 4  ;;  %v25_v0 = vld [vmem:[#allocation2] sm:$0xff]  ;;  %v26_v1 = vld [vmem:[#allocation2 + $0x8] sm:$0xff]  ;;  %s36_s17 = int_to_ptr.hbm [resolvable:$true] %s35_s17 }
   0x7   :  { %s33_s14 = sshll.u32 %s107_s13, 4  ;;  %27 = vst [vmem:[#allocation5] sm:$0xff] %v25_v0  ;;  %s34_s14 = int_to_ptr.vmem [resolvable:$true] %s33_s14 }
   0x8   :  { %28 = vst [vmem:[#allocation5 + $0x8] sm:$0xff] %v26_v1 }
   0x9   :  { %41 = dma.vmem_to_hbm [thread:$0]  %s34_s14, 256, %s36_s17, [#allocation4], %s105_s11, %s105_s11, %s106_s12  }
   0xa   :  { %102 = dma.done.wait [#allocation4], 256  }
   0xb   :  { %103 = vsyncadd [#allocation4], 4294967040 }
   0xc   :  { %46 = vsyncpa [#allocation3], 1 }
   0xd   :  { %47 = vsyncpa [#allocation4], 1 }

</bundles_post_ra>
